<compile_context>
chip_gen: v7x
topology: tpu7x:2x2x1
jax: 0.10.0
libtpu: 0.0.40
codegen_flags: <defaults>
</compile_context>

<pallas_src>
import functools

import jax
import jax.numpy as jnp
from jax.experimental import pallas as pl
from jax.experimental.pallas import tpu as pltpu


def _round_up(n, m):
    return ((n + m - 1) // m) * m


# ----------------------------------------------------------------------------
# Kernel
# ----------------------------------------------------------------------------
def actor_critic_kernel(x_ref, w0_ref, b0_ref, w1_ref, b1_ref, w2_ref, b2_ref,
                        out_ref, *, action_dim):
    cdt = w0_ref.dtype  # matmul-input dtype (f32 or bf16); accumulation is f32

    x = x_ref[...]

    # shared trunk: h = tanh(x @ W0 + b0)                     (TILE_B, H_pad)
    h = jnp.tanh(
        jnp.dot(x, w0_ref[...], preferred_element_type=jnp.float32) + b0_ref[...]
    )

    # fused actor/critic hidden layer: one AC_pad-wide GEMM   (TILE_B, AC_pad)
    #   cols [0:hidden)          -> actor hidden activation
    #   cols [hidden:2*hidden)   -> critic hidden activation
    ac = jnp.tanh(
        jnp.dot(h.astype(cdt), w1_ref[...], preferred_element_type=jnp.float32)
        + b1_ref[...]
    )

    # fused output layer (block-diagonal W2): one lane-dense GEMM
    #   cols [0:action_dim)  -> mu pre-activation (tanh)
    #   col  [action_dim]    -> value (linear); padding cols stay linear zeros
    pre = (
        jnp.dot(ac.astype(cdt), w2_ref[...], preferred_element_type=jnp.float32)
        + b2_ref[...]
    )

    col = jax.lax.broadcasted_iota(jnp.int32, pre.shape, 1)
    out_ref[...] = jnp.where(col < action_dim, jnp.tanh(pre), pre).astype(out_ref.dtype)


# ----------------------------------------------------------------------------
# Parameter packing: fuse + pad to lane-dense shapes (done once, outside step)
# ----------------------------------------------------------------------------
def pack_params(p, state_dim, action_dim, hidden, param_dtype=jnp.float32):
    S_pad = _round_up(state_dim, 8)           # feature dim: only sublane-pad
    H_pad = _round_up(hidden, 128)            # trunk output lanes
    AC_pad = _round_up(2 * hidden, 128)       # fused actor+critic hidden lanes
    c_off = hidden                            # critic hidden starts here
    OUT_PAD = _round_up(action_dim + 1, 128)  # mu cols + value col, lane-dense

    w0 = jnp.zeros((S_pad, H_pad), jnp.float32).at[:state_dim, :hidden].set(p["ws"])
    b0 = jnp.zeros((1, H_pad), jnp.float32).at[:, :hidden].set(p["bs"])

    w1 = jnp.zeros((H_pad, AC_pad), jnp.float32)
    w1 = w1.at[:hidden, :hidden].set(p["wa1"])
    w1 = w1.at[:hidden, c_off:c_off + hidden].set(p["wc1"])
    b1 = jnp.zeros((1, AC_pad), jnp.float32)
    b1 = b1.at[:, :hidden].set(p["ba1"])
    b1 = b1.at[:, c_off:c_off + hidden].set(p["bc1"])

    w2 = jnp.zeros((AC_pad, OUT_PAD), jnp.float32)
    w2 = w2.at[:hidden, :action_dim].set(p["wa2"])
    w2 = w2.at[c_off:c_off + hidden, action_dim:action_dim + 1].set(p["wc2"])
    b2 = jnp.zeros((1, OUT_PAD), jnp.float32)
    b2 = b2.at[:, :action_dim].set(p["ba2"])
    b2 = b2.at[:, action_dim:action_dim + 1].set(p["bc2"])

    return {
        # matmul operands in param_dtype (bf16 on v6e/v7x for MXU-native rate)
        "w0": w0.astype(param_dtype),
        "w1": w1.astype(param_dtype),
        "w2": w2.astype(param_dtype),
        # biases stay f32 (added post-accumulation; negligible DMA)
        "b0": b0, "b1": b1, "b2": b2,
        "log_std": p["log_std"],
        "dims": (state_dim, action_dim, hidden, S_pad, H_pad, AC_pad, OUT_PAD),
    }


# ----------------------------------------------------------------------------
# Wrapper
# ----------------------------------------------------------------------------
def actor_critic_forward(x, packed):
    state_dim, action_dim, hidden, S_pad, H_pad, AC_pad, OUT_PAD = packed["dims"]
    dt = packed["w0"].dtype
    B = x.shape[0]

    # Batch tiling:
    #  * >= 2 tiles whenever B > 8 so the "parallel" axis shards across both
    #    v7x TensorCores,
    #  * capped at 1024 rows/tile (footprint < ~3 MiB, safe for v5e's 16 MiB
    #    scoped-VMEM default) while amortizing the ~0.35us per-grid-step cost.
    TILE_B = min(1024, max(8, _round_up(pl.cdiv(B, 2), 8)))
    B_pad = _round_up(max(B, 1), TILE_B)
    grid = (B_pad // TILE_B,)

    # Pad only the batch dim (and feature dim to a multiple of 8); no 128-wide
    # feature padding and no copy at all when shapes already line up.
    if (B_pad, S_pad) != (B, state_dim) or x.dtype != dt:
        x_pad = jnp.pad(x.astype(dt), ((0, B_pad - B), (0, S_pad - state_dim)))
    else:
        x_pad = x

    isz = jnp.dtype(dt).itemsize
    cost = pl.CostEstimate(
        flops=2 * B_pad * (S_pad * H_pad + H_pad * AC_pad + AC_pad * OUT_PAD),
        transcendentals=B_pad * (H_pad + AC_pad + OUT_PAD),
        bytes_accessed=(
            isz * (B_pad * S_pad
                   + S_pad * H_pad + H_pad * AC_pad + AC_pad * OUT_PAD)
            + 4 * (H_pad + AC_pad + OUT_PAD)          # f32 biases
            + 4 * B_pad * OUT_PAD                     # f32 output slab
        ),
    )

    out = pl.pallas_call(
        functools.partial(actor_critic_kernel, action_dim=action_dim),
        out_shape=jax.ShapeDtypeStruct((B_pad, OUT_PAD), jnp.float32),
        grid=grid,
        in_specs=[
            pl.BlockSpec((TILE_B, S_pad), lambda i: (i, 0)),        # x tile
            pl.BlockSpec((S_pad, H_pad), lambda i: (0, 0)),         # w0 (resident)
            pl.BlockSpec((1, H_pad), lambda i: (0, 0)),             # b0
            pl.BlockSpec((H_pad, AC_pad), lambda i: (0, 0)),        # w1 fused
            pl.BlockSpec((1, AC_pad), lambda i: (0, 0)),            # b1 fused
            pl.BlockSpec((AC_pad, OUT_PAD), lambda i: (0, 0)),      # w2 fused
            pl.BlockSpec((1, OUT_PAD), lambda i: (0, 0)),           # b2 fused
        ],
        out_specs=pl.BlockSpec((TILE_B, OUT_PAD), lambda i: (i, 0)),
        compiler_params=pltpu.CompilerParams(
            dimension_semantics=("parallel",),
        ),
        cost_estimate=cost,
    )(
        x_pad,
        packed["w0"], packed["b0"],
        packed["w1"], packed["b1"],
        packed["w2"], packed["b2"],
    )

    mu = out[:B, :action_dim]
    value = out[:B, action_dim:action_dim + 1]
    # std = exp(log_std).expand_as(mu) is batch-independent: done outside the kernel.
    std = jnp.broadcast_to(jnp.exp(packed["log_std"]), (B, action_dim))
    return (mu, std), value


# ----------------------------------------------------------------------------
# Init + pure-JAX reference
# ----------------------------------------------------------------------------
def init_params(key, state_dim, action_dim, hidden_size=64):
    """Deterministic synthetic init (uniform, PyTorch-Linear-like bounds)."""
    ks = jax.random.split(key, 10)

    def linear(kw, kb, fan_in, fan_out):
        bound = 1.0 / jnp.sqrt(fan_in)
        w = jax.random.uniform(kw, (fan_in, fan_out), jnp.float32, -bound, bound)
        b = jax.random.uniform(kb, (1, fan_out), jnp.float32, -bound, bound)
        return w, b

    ws, bs = linear(ks[0], ks[1], state_dim, hidden_size)
    wa1, ba1 = linear(ks[2], ks[3], hidden_size, hidden_size)
    wa2, ba2 = linear(ks[4], ks[5], hidden_size, action_dim)
    wc1, bc1 = linear(ks[6], ks[7], hidden_size, hidden_size)
    wc2, bc2 = linear(ks[8], ks[9], hidden_size, 1)
    log_std = jnp.zeros((1, action_dim), jnp.float32)

    return {
        "ws": ws, "bs": bs,
        "wa1": wa1, "ba1": ba1,
        "wa2": wa2, "ba2": ba2,
        "log_std": log_std,
        "wc1": wc1, "bc1": bc1,
        "wc2": wc2, "bc2": bc2,
    }


def reference_forward(x, p):
    h = jnp.tanh(x @ p["ws"] + p["bs"])
    a = jnp.tanh(h @ p["wa1"] + p["ba1"])
    mu = jnp.tanh(a @ p["wa2"] + p["ba2"])
    std = jnp.broadcast_to(jnp.exp(p["log_std"]), mu.shape)
    c = jnp.tanh(h @ p["wc1"] + p["bc1"])
    value = c @ p["wc2"] + p["bc2"]
    return (mu, std), value


if __name__ == "__main__":
    key = jax.random.PRNGKey(0)
    k_x, k_p = jax.random.split(key)

    batch = 2
    state_dim = 8
    action_dim = 4
    hidden_size = 32

    x = jax.random.normal(k_x, (batch, state_dim), jnp.float32)
    params = init_params(k_p, state_dim, action_dim, hidden_size)

    # pure-JAX reference
    (mu_r, std_r), value_r = reference_forward(x, params)

    # ---- f32 path (exact vs reference) ----
    packed = pack_params(params, state_dim, action_dim, hidden_size)
    (mu, std), value = actor_critic_forward(x, packed)
    jax.block_until_ready((mu, std, value))

    assert mu.shape == (batch, action_dim)
    assert std.shape == (batch, action_dim)
    assert value.shape == (batch, 1)
    assert jnp.allclose(mu, mu_r, atol=1e-5)
    assert jnp.allclose(std, std_r, atol=1e-5)
    assert jnp.allclose(value, value_r, atol=1e-5)

    # ---- bf16 weights/activations (v6e/v7x MXU-native; f32 accumulation) ----
    packed_bf16 = pack_params(params, state_dim, action_dim, hidden_size,
                              param_dtype=jnp.bfloat16)
    (mu_b, std_b), value_b = actor_critic_forward(x, packed_bf16)
    jax.block_until_ready((mu_b, std_b, value_b))
    assert jnp.allclose(mu_b, mu_r, atol=5e-2)
    assert jnp.allclose(value_b, value_r, atol=5e-2)

    print("KERNEL_OK")
</pallas_src>

<mosaic_0001>
module attributes {stable_mosaic.version = 11 : i64} {
  func.func @actor_critic_kernel(%arg0: i32, %arg1: memref<8x8xf32, #tpu.memory_space<vmem>>, %arg2: memref<8x128xf32, #tpu.memory_space<vmem>>, %arg3: memref<1x128xf32, #tpu.memory_space<vmem>>, %arg4: memref<128x128xf32, #tpu.memory_space<vmem>>, %arg5: memref<1x128xf32, #tpu.memory_space<vmem>>, %arg6: memref<128x128xf32, #tpu.memory_space<vmem>>, %arg7: memref<1x128xf32, #tpu.memory_space<vmem>>, %arg8: memref<8x128xf32, #tpu.memory_space<vmem>>) attributes {dimension_semantics = [#tpu.dimension_semantics<parallel>], iteration_bounds = array<i64: 1>, scalar_prefetch = 0 : i64, scratch_operands = 0 : i64, tpu.core_type = #tpu.core_type<tc>, window_params = [{transform_indices = @transform_0, window_bounds = array<i64: 8, 8>}, {pipeline_mode = #tpu.pipeline_mode<synchronous>, transform_indices = @transform_1, window_bounds = array<i64: 8, 128>}, {pipeline_mode = #tpu.pipeline_mode<synchronous>, transform_indices = @transform_2, window_bounds = array<i64: 1, 128>}, {pipeline_mode = #tpu.pipeline_mode<synchronous>, transform_indices = @transform_3, window_bounds = array<i64: 128, 128>}, {pipeline_mode = #tpu.pipeline_mode<synchronous>, transform_indices = @transform_4, window_bounds = array<i64: 1, 128>}, {pipeline_mode = #tpu.pipeline_mode<synchronous>, transform_indices = @transform_5, window_bounds = array<i64: 128, 128>}, {pipeline_mode = #tpu.pipeline_mode<synchronous>, transform_indices = @transform_6, window_bounds = array<i64: 1, 128>}, {transform_indices = @transform_7, window_bounds = array<i64: 8, 128>}]} {
    %c0 = arith.constant 0 : index
    %c0_0 = arith.constant 0 : index
    %0 = vector.load %arg1[%c0, %c0_0] : memref<8x8xf32, #tpu.memory_space<vmem>>, vector<8x8xf32>
    %c0_1 = arith.constant 0 : index
    %c0_2 = arith.constant 0 : index
    %1 = vector.load %arg2[%c0_1, %c0_2] : memref<8x128xf32, #tpu.memory_space<vmem>>, vector<8x128xf32>
    %cst = arith.constant dense<0.000000e+00> : vector<8x128xf32>
    %2 = tpu.matmul %0, %1, %cst {dimension_numbers = #tpu.dot_dimension_numbers<[1], [0], [0], [1], [0, 0, 1, 1], [], []>} : vector<8x8xf32>, vector<8x128xf32>, vector<8x128xf32> -> vector<8x128xf32>
    %c0_3 = arith.constant 0 : index
    %c0_4 = arith.constant 0 : index
    %3 = vector.load %arg3[%c0_3, %c0_4] : memref<1x128xf32, #tpu.memory_space<vmem>>, vector<1x128xf32>
    %4 = vector.broadcast %3 : vector<1x128xf32> to vector<8x128xf32>
    %5 = arith.addf %2, %4 : vector<8x128xf32>
    %6 = math.tanh %5 : vector<8x128xf32>
    %c0_5 = arith.constant 0 : index
    %c0_6 = arith.constant 0 : index
    %7 = vector.load %arg4[%c0_5, %c0_6] : memref<128x128xf32, #tpu.memory_space<vmem>>, vector<128x128xf32>
    %cst_7 = arith.constant dense<0.000000e+00> : vector<8x128xf32>
    %8 = tpu.matmul %6, %7, %cst_7 {dimension_numbers = #tpu.dot_dimension_numbers<[1], [0], [0], [1], [0, 0, 1, 1], [], []>} : vector<8x128xf32>, vector<128x128xf32>, vector<8x128xf32> -> vector<8x128xf32>
    %c0_8 = arith.constant 0 : index
    %c0_9 = arith.constant 0 : index
    %9 = vector.load %arg5[%c0_8, %c0_9] : memref<1x128xf32, #tpu.memory_space<vmem>>, vector<1x128xf32>
    %10 = vector.broadcast %9 : vector<1x128xf32> to vector<8x128xf32>
    %11 = arith.addf %8, %10 : vector<8x128xf32>
    %12 = math.tanh %11 : vector<8x128xf32>
    %c0_10 = arith.constant 0 : index
    %c0_11 = arith.constant 0 : index
    %13 = vector.load %arg6[%c0_10, %c0_11] : memref<128x128xf32, #tpu.memory_space<vmem>>, vector<128x128xf32>
    %cst_12 = arith.constant dense<0.000000e+00> : vector<8x128xf32>
    %14 = tpu.matmul %12, %13, %cst_12 {dimension_numbers = #tpu.dot_dimension_numbers<[1], [0], [0], [1], [0, 0, 1, 1], [], []>} : vector<8x128xf32>, vector<128x128xf32>, vector<8x128xf32> -> vector<8x128xf32>
    %c0_13 = arith.constant 0 : index
    %c0_14 = arith.constant 0 : index
    %15 = vector.load %arg7[%c0_13, %c0_14] : memref<1x128xf32, #tpu.memory_space<vmem>>, vector<1x128xf32>
    %16 = vector.broadcast %15 : vector<1x128xf32> to vector<8x128xf32>
    %17 = arith.addf %14, %16 : vector<8x128xf32>
    %18 = tpu.iota {dimensions = array<i32: 1>} : vector<8x128xi32>
    %c4_i32 = arith.constant 4 : i32
    %19 = vector.broadcast %c4_i32 : i32 to vector<8x128xi32>
    %20 = arith.cmpi slt, %18, %19 : vector<8x128xi32>
    %21 = math.tanh %17 : vector<8x128xf32>
    %22 = arith.select %20, %21, %17 : vector<8x128xi1>, vector<8x128xf32>
    %c0_15 = arith.constant 0 : index
    %c0_16 = arith.constant 0 : index
    %23 = vector.load %arg8[%c0_15, %c0_16] : memref<8x128xf32, #tpu.memory_space<vmem>>, vector<8x128xf32>
    tpu.vector_store %arg8[%c0_15, %c0_16], %22 {strides = array<i32>} : memref<8x128xf32, #tpu.memory_space<vmem>>, vector<8x128xf32>,
    return
  }
  func.func @transform_0(%arg0: i32) -> (i32, i32) {
    %c0_i32 = arith.constant 0 : i32
    %c0_i32_0 = arith.constant 0 : i32
    return %arg0, %c0_i32 : i32, i32
  }
  func.func @transform_1(%arg0: i32) -> (i32, i32) {
    %c0_i32 = arith.constant 0 : i32
    %c0_i32_0 = arith.constant 0 : i32
    %c0_i32_1 = arith.constant 0 : i32
    return %c0_i32, %c0_i32_0 : i32, i32
  }
  func.func @transform_2(%arg0: i32) -> (i32, i32) {
    %c0_i32 = arith.constant 0 : i32
    %c0_i32_0 = arith.constant 0 : i32
    %c0_i32_1 = arith.constant 0 : i32
    return %c0_i32, %c0_i32_0 : i32, i32
  }
  func.func @transform_3(%arg0: i32) -> (i32, i32) {
    %c0_i32 = arith.constant 0 : i32
    %c0_i32_0 = arith.constant 0 : i32
    %c0_i32_1 = arith.constant 0 : i32
    return %c0_i32, %c0_i32_0 : i32, i32
  }
  func.func @transform_4(%arg0: i32) -> (i32, i32) {
    %c0_i32 = arith.constant 0 : i32
    %c0_i32_0 = arith.constant 0 : i32
    %c0_i32_1 = arith.constant 0 : i32
    return %c0_i32, %c0_i32_0 : i32, i32
  }
  func.func @transform_5(%arg0: i32) -> (i32, i32) {
    %c0_i32 = arith.constant 0 : i32
    %c0_i32_0 = arith.constant 0 : i32
    %c0_i32_1 = arith.constant 0 : i32
    return %c0_i32, %c0_i32_0 : i32, i32
  }
  func.func @transform_6(%arg0: i32) -> (i32, i32) {
    %c0_i32 = arith.constant 0 : i32
    %c0_i32_0 = arith.constant 0 : i32
    %c0_i32_1 = arith.constant 0 : i32
    return %c0_i32, %c0_i32_0 : i32, i32
  }
  func.func @transform_7(%arg0: i32) -> (i32, i32) {
    %c0_i32 = arith.constant 0 : i32
    %c0_i32_0 = arith.constant 0 : i32
    return %arg0, %c0_i32 : i32, i32
  }
}

</mosaic_0001>

<bundles_post_ra>
// kernel: tpu_custom_call.1
= control target key start
LH: loop header
LB: loop body
LE: loop exit
PB: predicated region body
PF: predicated region fallthrough
CT: control target
= control target key end

     0   :  { %12 = vsyncpa [#allocation3], 0  ;;  %s807_s0 = inlined_call_operand.hbm [shape: f32[8,8], index: 0, kind: input, shape index: {}]   ;;  %s808_s1 = inlined_call_operand.hbm [shape: f32[8,128], index: 1, kind: input, shape index: {}]   ;;  %s809_s2 = inlined_call_operand.vmem [shape: f32[1,128], index: 2, kind: input, shape index: {}]   ;;  %s810_s3 = inlined_call_operand.hbm [shape: f32[128,128], index: 3, kind: input, shape index: {}]   ;;  %s811_s4 = inlined_call_operand.vmem [shape: f32[1,128], index: 4, kind: input, shape index: {}]   ;;  %s812_s5 = inlined_call_operand.hbm [shape: f32[128,128], index: 5, kind: input, shape index: {}]   ;;  %s813_s6 = inlined_call_operand.vmem [shape: f32[1,128], index: 6, kind: input, shape index: {}]   ;;  %s814_s7 = inlined_call_operand.hbm [shape: f32[8,128], index: 7, kind: output, shape index: {}]  }
   0x1   :  { %13 = vsyncpa [#allocation6], 0 }
   0x2   :  { %14 = vsyncpa [#allocation9], 0 }
   0x3   :  { %15 = vsyncpa [#allocation4], 0  ;;  %s669_s24 = smov [#allocation5]   ;;  %s670_s26 = smov [#allocation2]  }
   0x4   :  { %s32_s25 = sshll.u32 %s669_s24, 4  ;;  %s22_s27 = sshll.u32 %s670_s26, 4  ;;  %s33_s25 = int_to_ptr.vmem [resolvable:$true] %s32_s25  ;;  %s23_s27 = int_to_ptr.vmem [resolvable:$true] %s22_s27 }
   0x5   :  { %s551_s30 = scalar_lea.hbm %s808_s1, 128 }
   0x6   :  { %p552_p0 = scmp.ne.s32.totalorder %s808_s1, %s551_s30  ;;  %p555_p1 = scmp.lt.u32.totalorder %s551_s30, %s808_s1 }
   0x8   :  { %p557_p2 = pnand %p555_p1, %p552_p0 }
   0xa   :  { %560 = shalt.err (!%p557_p2)
}
   0xb   :  { %s561_s12 = scalar_lea.vmem %s33_s25, 128  ;;  %p566_p4 = scmp.lt.s32.totalorder %s33_s25, %s33_s25 }
   0xc   :  { %p562_p3 = scmp.ne.s32.totalorder %s33_s25, %s561_s12  ;;  %p567_p5 = scmp.lt.s32.totalorder %s561_s12, %s561_s12 }
   0xe   :  { %p568_p6 = por %p567_p5, %p566_p4 }
  0x10   :  { %p569_p7 = pnand %p568_p6, %p562_p3 }
  0x12   :  { %572 = shalt.err (!%p569_p7)
}
  0x13   :  { %35 = dma.hbm_to_vmem [thread:$0]  %s808_s1, 128, %s33_s25, [#allocation6]  }
  0x14   :  { %s573_s17 = scalar_lea.hbm %s807_s0, 128 }
  0x15   :  { %p574_p8 = scmp.ne.s32.totalorder %s807_s0, %s573_s17  ;;  %p577_p9 = scmp.lt.u32.totalorder %s573_s17, %s807_s0 }
  0x17   :  { %p579_p10 = pnand %p577_p9, %p574_p8 }
  0x19   :  { %582 = shalt.err (!%p579_p10)
}
  0x1a   :  { %s583_s22 = scalar_lea.vmem %s23_s27, 128  ;;  %p588_p12 = scmp.lt.s32.totalorder %s23_s27, %s23_s27 }
  0x1b   :  { %p584_p11 = scmp.ne.s32.totalorder %s23_s27, %s583_s22  ;;  %p589_p13 = scmp.lt.s32.totalorder %s583_s22, %s583_s22 }
  0x1d   :  { %p590_p0 = por %p589_p13, %p588_p12 }
  0x1f   :  { %p591_p1 = pnand %p590_p0, %p584_p11 }
  0x21   :  { %594 = shalt.err (!%p591_p1)
}
  0x22   :  { %25 = dma.hbm_to_vmem [thread:$0]  %s807_s0, 128, %s23_s27, [#allocation3]  }
  0x23   :  { %s671_s24 = smov [#allocation7]   ;;  %s595_s29 = scalar_lea.hbm %s810_s3, 2048 }
  0x24   :  { %s43_s25 = sshll.u32 %s671_s24, 4  ;;  %p596_p2 = scmp.ne.s32.totalorder %s810_s3, %s595_s29  ;;  %s44_s25 = int_to_ptr.vmem [resolvable:$true] %s43_s25 }
  0x25   :  { %p599_p3 = scmp.lt.u32.totalorder %s595_s29, %s810_s3 }
  0x27   :  { %p601_p4 = pnand %p599_p3, %p596_p2 }
  0x29   :  { %604 = shalt.err (!%p601_p4)
}
  0x2a   :  { %s605_s11 = scalar_lea.vmem %s44_s25, 2048  ;;  %p610_p6 = scmp.lt.s32.totalorder %s44_s25, %s44_s25 }
  0x2b   :  { %p606_p5 = scmp.ne.s32.totalorder %s44_s25, %s605_s11  ;;  %p611_p7 = scmp.lt.s32.totalorder %s605_s11, %s605_s11 }
  0x2d   :  { %p612_p8 = por %p611_p7, %p610_p6 }
  0x2f   :  { %p613_p9 = pnand %p612_p8, %p606_p5 }
  0x31   :  { %616 = shalt.err (!%p613_p9)
}
  0x32   :  { %s672_s0 = smov 128   ;;  %s673_s27 = smov 8  }
  0x33   :  { %49 = dma.hbm_to_vmem [thread:$0]  %s810_s3, 2048, %s44_s25, [#allocation6], %s672_s0, %s672_s0, %s673_s27  }
  0x34   :  { %s674_s14 = smov [#allocation8]   ;;  %s617_s18 = scalar_lea.hbm %s812_s5, 2048 }
  0x35   :  { %s57_s15 = sshll.u32 %s674_s14, 4  ;;  %p618_p10 = scmp.ne.s32.totalorder %s812_s5, %s617_s18  ;;  %s58_s15 = int_to_ptr.vmem [resolvable:$true] %s57_s15 }
  0x36   :  { %p621_p11 = scmp.lt.u32.totalorder %s617_s18, %s812_s5 }
  0x38   :  { %p623_p12 = pnand %p621_p11, %p618_p10 }
  0x3a   :  { %626 = shalt.err (!%p623_p12)
}
  0x3b   :  { %s627_s1 = scalar_lea.vmem %s58_s15, 2048  ;;  %p632_p0 = scmp.lt.s32.totalorder %s58_s15, %s58_s15 }
  0x3c   :  { %p628_p13 = scmp.ne.s32.totalorder %s58_s15, %s627_s1  ;;  %p633_p1 = scmp.lt.s32.totalorder %s627_s1, %s627_s1 }
  0x3e   :  { %p634_p2 = por %p633_p1, %p632_p0 }
  0x40   :  { %p635_p3 = pnand %p634_p2, %p628_p13 }
  0x42   :  { %638 = shalt.err (!%p635_p3)
}
  0x43   :  { %63 = dma.hbm_to_vmem [thread:$0]  %s812_s5, 2048, %s58_s15, [#allocation9], %s672_s0, %s672_s0, %s673_s27  }
  0x44   :  { %661 = dma.done.wait [#allocation3], 128  }
  0x45   :  { %662 = vsyncadd [#allocation3], 4294967168 }
  0x46   :  { %663 = dma.done.wait [#allocation6], 2176  }
  0x47   :  { %664 = vsyncadd [#allocation6], 4294965120 }
  0x48   :  { %665 = dma.done.wait [#allocation9], 2048  }
  0x49   :  { %666 = vsyncadd [#allocation9], 4294965248  ;;  %v675_v0 = vmov 0.0   ;;  %vm676_vm0 = vmmov 0   ;;  %v677_v1 = vmov 0.0|0.0   ;;  %vm87_vm1 = vcmask 64512  }
  0x4a   :  { %412 = vmatprep.subr.mxu0 %v675_v0  ;;  %414 = vmatprep.mubr.msk.f32.mxu0 %vm676_vm0, %v675_v0  ;;  %v79_v2 = vld [vmem:[#allocation5] sm:$0xff]  ;;  %v78_v3 = vld [vmem:[#allocation2] sm:$0xff]  ;;  %v162_v4 = vld [vmem:[#allocation7] sm:$0xff]  ;;  %s678_s29 = smov [#allocation10]  }
  0x4b   :  { %487 = vmatprep.subr.bf16.mxu1 %v677_v1  ;;  %449 = vmatprep.mubr.msk.f32.mxu1 %vm676_vm0, %v675_v0  ;;  %v163_v5 = vld [vmem:[#allocation7 + $0x8] sm:$0xff]  ;;  %v164_v6 = vld [vmem:[#allocation7 + $0x10] sm:$0xff]  ;;  %v165_v7 = vld [vmem:[#allocation7 + $0x18] sm:$0xff]  ;;  %s361_s30 = sshll.u32 %s678_s29, 4  ;;  %s362_s30 = int_to_ptr.vmem [resolvable:$true] %s361_s30 }
  0x4c   :  { %413 = vmatpush3.msra.mxu0 %v79_v2  ;;  %v488_v8 = vpack.c.bf16 %v163_v5, %v162_v4  ;;  %v491_v9 = vpack.c.bf16 %v165_v7, %v164_v6  ;;  %v166_v10 = vld [vmem:[#allocation7 + $0x20] sm:$0xff]  ;;  %v167_v11 = vld [vmem:[#allocation7 + $0x28] sm:$0xff]  ;;  %v168_v13 = vld [vmem:[#allocation7 + $0x30] sm:$0xff]  ;;  %p644_p5 = scmp.lt.s32.totalorder %s362_s30, %s362_s30 }
  0x4d   :  { %415 = vmatmul.mubr.msk.f32.vlgmr.msra.gmra.mrb[0].mxu0 %vm87_vm1, %v78_v3  ;;  %511 = vmatprep.subr.bf16.mxu0 %v677_v1  ;;  %v494_v12 = vpack.c.bf16 %v167_v11, %v166_v10  ;;  %v169_v14 = vld [vmem:[#allocation7 + $0x38] sm:$0xff]  ;;  %v170_v16 = vld [vmem:[#allocation7 + $0x40] sm:$0xff]  ;;  %v171_v17 = vld [vmem:[#allocation7 + $0x48] sm:$0xff] }
  0x4e   :  { %484 = vmatprep.mubr.msk.f32.mxu0 %vm676_vm0, %v675_v0  ;;  %489 = vmatpush3.bf16.msra.mxu1 %v488_v8  ;;  %v497_v15 = vpack.c.bf16 %v169_v14, %v168_v13  ;;  %v500_v18 = vpack.c.bf16 %v171_v17, %v170_v16  ;;  %v172_v19 = vld [vmem:[#allocation7 + $0x50] sm:$0xff]  ;;  %v173_v20 = vld [vmem:[#allocation7 + $0x58] sm:$0xff]  ;;  %v174_v22 = vld [vmem:[#allocation7 + $0x60] sm:$0xff] }
  0x4f   :  { %490 = vmatprep.subr.bf16.mxu1 %v677_v1  ;;  %v503_v21 = vpack.c.bf16 %v173_v20, %v172_v19  ;;  %v175_v23 = vld [vmem:[#allocation7 + $0x68] sm:$0xff]  ;;  %v176_v25 = vld [vmem:[#allocation7 + $0x70] sm:$0xff]  ;;  %v177_v26 = vld [vmem:[#allocation7 + $0x78] sm:$0xff] }
  0x50   :  { %v506_v24 = vpack.c.bf16 %v175_v23, %v174_v22  ;;  %v509_v27 = vpack.c.bf16 %v177_v26, %v176_v25  ;;  %v256_v28 = vld [vmem:[#allocation8] sm:$0xff]  ;;  %v257_v29 = vld [vmem:[#allocation8 + $0x8] sm:$0xff]  ;;  %v258_v30 = vld [vmem:[#allocation8 + $0x10] sm:$0xff] }
  0x51   :  { %v512_v31 = vpack.c.bf16 %v257_v29, %v256_v28  ;;  %v259_v32 = vld [vmem:[#allocation8 + $0x18] sm:$0xff]  ;;  %v260_v34 = vld [vmem:[#allocation8 + $0x20] sm:$0xff]  ;;  %v261_v35 = vld [vmem:[#allocation8 + $0x28] sm:$0xff] }
  0x52   :  { %492 = vmatpush3.bf16.msra.mxu1 %v491_v9  ;;  %v515_v33 = vpack.c.bf16 %v259_v32, %v258_v30  ;;  %v518_v36 = vpack.c.bf16 %v261_v35, %v260_v34  ;;  %v262_v37 = vld [vmem:[#allocation8 + $0x30] sm:$0xff]  ;;  %v263_v38 = vld [vmem:[#allocation8 + $0x38] sm:$0xff]  ;;  %v264_v40 = vld [vmem:[#allocation8 + $0x40] sm:$0xff] }
  0x53   :  { %493 = vmatprep.subr.bf16.mxu1 %v677_v1  ;;  %513 = vmatpush3.bf16.msra.mxu0 %v512_v31  ;;  %v521_v39 = vpack.c.bf16 %v263_v38, %v262_v37  ;;  %v265_v41 = vld [vmem:[#allocation8 + $0x48] sm:$0xff]  ;;  %v372_v43 = vld [vmem:[%s809_s2] ss:$0 sm:$0xff]  ;;  %v267_v49 = vld [vmem:[#allocation8 + $0x58] sm:$0xff] }
  0x54   :  { %514 = vmatprep.subr.bf16.mxu0 %v677_v1  ;;  %v524_v42 = vpack.c.bf16 %v265_v41, %v264_v40  ;;  %v266_v48 = vld [vmem:[#allocation8 + $0x50] sm:$0xff]  ;;  %v268_v51 = vld [vmem:[#allocation8 + $0x60] sm:$0xff]  ;;  %v269_v52 = vld [vmem:[#allocation8 + $0x68] sm:$0xff] }
  0x55   :  { %v527_v50 = vpack.c.bf16 %v267_v49, %v266_v48  ;;  %v530_v53 = vpack.c.bf16 %v269_v52, %v268_v51  ;;  %v270_v54 = vld [vmem:[#allocation8 + $0x70] sm:$0xff]  ;;  %v271_v55 = vld [vmem:[#allocation8 + $0x78] sm:$0xff] }
  0x56   :  { %495 = vmatpush3.bf16.msra.mxu1 %v494_v12  ;;  %v533_v56 = vpack.c.bf16 %v271_v55, %v270_v54  ;;  %v374_v57 = vld [vmem:[%s811_s4] ss:$0 sm:$0xff]  ;;  %s639_s4 = scalar_lea.vmem %s362_s30, 128 }
  0x57   :  { %496 = vmatprep.subr.bf16.mxu1 %v677_v1  ;;  %516 = vmatpush3.bf16.msra.mxu0 %v515_v33  ;;  %v375_v62 = vld [vmem:[%s813_s6] ss:$0 sm:$0xff]  ;;  %p640_p4 = scmp.ne.s32.totalorder %s362_s30, %s639_s4  ;;  %p645_p6 = scmp.lt.s32.totalorder %s639_s4, %s639_s4 }
  0x58   :  { %517 = vmatprep.subr.bf16.mxu0 %v677_v1 }
  0x59   :  { %p646_p7 = por %p645_p6, %p644_p5 }
  0x5a   :  { %498 = vmatpush3.bf16.msra.mxu1 %v497_v15 }
  0x5b   :  { %499 = vmatprep.subr.bf16.mxu1 %v677_v1  ;;  %519 = vmatpush3.bf16.msra.mxu0 %v518_v36  ;;  %p647_p8 = pnand %p646_p7, %p640_p4 }
  0x5c   :  { %520 = vmatprep.subr.bf16.mxu0 %v677_v1 }
  0x5e   :  { %501 = vmatpush3.bf16.msra.mxu1 %v500_v18 }
  0x5f   :  { %502 = vmatprep.subr.bf16.mxu1 %v677_v1  ;;  %522 = vmatpush3.bf16.msra.mxu0 %v521_v39 }
  0x60   :  { %523 = vmatprep.subr.bf16.mxu0 %v677_v1 }
  0x62   :  { %504 = vmatpush3.bf16.msra.mxu1 %v503_v21 }
  0x63   :  { %505 = vmatprep.subr.bf16.mxu1 %v677_v1  ;;  %525 = vmatpush3.bf16.msra.mxu0 %v524_v42 }
  0x64   :  { %526 = vmatprep.subr.bf16.mxu0 %v677_v1 }
  0x66   :  { %507 = vmatpush3.bf16.msra.mxu1 %v506_v24 }
  0x67   :  { %508 = vmatprep.subr.bf16.mxu1 %v677_v1  ;;  %528 = vmatpush3.bf16.msra.mxu0 %v527_v50 }
  0x68   :  { %529 = vmatprep.subr.bf16.mxu0 %v677_v1 }
  0x6a   :  { %510 = vmatpush3.bf16.msra.mxu1 %v509_v27 }
  0x6b   :  { %531 = vmatpush3.bf16.msra.mxu0 %v530_v53 }
  0x6c   :  { %532 = vmatprep.subr.bf16.mxu0 %v677_v1  ;;  %v349_v1 = vlaneseq }
  0x6e   :  { %v350_v3 = vand.u32 127, %v349_v1 }
  0x6f   :  { %534 = vmatpush3.bf16.msra.mxu0 %v533_v56 }
  0x70   :  { %vm351_vm2 = vcmp.lt.s32.totalorder %v350_v3, 4 }
 0x120   :  { %v157_v44 = vpop.f32.mrb[0].mxu0 }
 0x121   :  { %v158_v45 = vadd.f32 %v372_v43, %v157_v44  ;;  %v416_v46 = vpop.f32.mrb[1].mxu0 }
 0x123   :  { %545 = vtanh.f32 %v158_v45 }
 0x12d   :  { %v546_v47 = vpop.eup %545 }
 0x12e   :  { %450 = vmatmul.mubr.f32.vlgmr.msra.gmra.mrb[0].mxu1 %v546_v47 }
 0x201   :  { %v251_v58 = vpop.f32.mrb[0].mxu1 }
 0x202   :  { %v252_v59 = vadd.f32 %v374_v57, %v251_v58  ;;  %v451_v60 = vpop.f32.mrb[1].mxu1 }
 0x204   :  { %547 = vtanh.f32 %v252_v59 }
 0x20e   :  { %v548_v61 = vpop.eup %547 }
 0x20f   :  { %485 = vmatmul.mubr.f32.vlgmr.msra.gmra.mrb[2].mxu0 %v548_v61 }
 0x2e2   :  { %v345_v63 = vpop.f32.mrb[2].mxu0 }
 0x2e3   :  { %v346_v0 = vadd.f32 %v375_v62, %v345_v63  ;;  %v486_v2 = vpop.f32.mrb[3].mxu0 }
 0x2e5   :  { %549 = vtanh.f32 %v346_v0 }
 0x2ef   :  { %v550_v4 = vpop.eup %549 }
 0x2f0   :  { %v353_v5 = vsel %vm351_vm2, %v550_v4, %v346_v0 }
 0x2f1   :  { %354 = vst [vmem:[#allocation10] sm:$0xff] %v353_v5 }
 0x2f2   :  { %650 = shalt.err (!%p647_p8)
}
 0x2f3   :  { %s651_s9 = scalar_lea.hbm %s814_s7, 128 }
 0x2f4   :  { %p652_p9 = scmp.ne.s32.totalorder %s814_s7, %s651_s9  ;;  %p655_p10 = scmp.lt.u32.totalorder %s651_s9, %s814_s7 }
 0x2f6   :  { %p657_p11 = pnand %p655_p10, %p652_p9 }
 0x2f8   :  { %660 = shalt.err (!%p657_p11)
}
 0x2f9   :  { %364 = dma.vmem_to_hbm [thread:$0]  %s362_s30, 128, %s814_s7, [#allocation4]  }
 0x2fa   :  { %667 = dma.done.wait [#allocation4], 128  }
 0x2fb   :  { %668 = vsyncadd [#allocation4], 4294967168 }
 0x2fc   :  { %368 = vsyncpa [#allocation3], 1 }
 0x2fd   :  { %369 = vsyncpa [#allocation6], 1 }
 0x2fe   :  { %370 = vsyncpa [#allocation9], 1 }
 0x2ff   :  { %371 = vsyncpa [#allocation4], 1 }

</bundles_post_ra>
